<compile_context>
chip_gen: v7x
topology: tpu7x:2x2x1
jax: 0.10.0
libtpu: 0.0.40
codegen_flags: <defaults>
</compile_context>

<pallas_src>
import functools

import jax
import jax.numpy as jnp
import numpy as np
from jax.experimental import pallas as pl
from jax.experimental.pallas import tpu as pltpu

EPS = 1e-5            # nn.InstanceNorm3d default eps
SLOPE = 0.2           # LeakyReLU negative_slope
STASH_DTYPE = jnp.bfloat16   # pass-1 y stash dtype (review: bf16 costs ~1/4 of re-reading x)


# ----------------------------------------------------------------------------- kernels

def _fused_kernel(x_ref, w1_ref, b1_ref, w2_ref, b2_ref, out_ref):
    """Single-pass path: x_ref (nb, Cin, P) -> out_ref (nb, num_cls, P); whole
    InstanceNorm window resident in VMEM."""
    w1 = w1_ref[...]
    b1 = b1_ref[...]
    w2 = w2_ref[...]
    b2 = b2_ref[...]
    nb = x_ref.shape[0]
    for b in range(nb):                                  # static unroll, nb is tiny
        x = x_ref[b].astype(jnp.float32)                 # bf16 -> f32 upcast (free under DMA)
        # Conv3d 1x1x1 (Cin -> mid) + bias: one MXU matmul.
        y = jnp.dot(w1, x, preferred_element_type=jnp.float32) + b1
        # InstanceNorm3d, one-pass stats: var = E[y^2] - mean^2.
        mean = jnp.mean(y, axis=1, keepdims=True)                       # (mid, 1)
        ex2 = jnp.mean(y * y, axis=1, keepdims=True)
        var = jnp.maximum(ex2 - mean * mean, 0.0)
        z = (y - mean) * jax.lax.rsqrt(var + EPS)
        # LeakyReLU(0.2) as max(z, 0.2*z): one mul + one max, no compare/select.
        a = jnp.maximum(z, SLOPE * z)
        # Conv3d 1x1x1 (mid -> num_cls) + bias.
        logits = jnp.dot(w2, a, preferred_element_type=jnp.float32) + b2
        # Channel softmax; one reciprocal per lane column instead of num_cls divides.
        m = jnp.max(logits, axis=0, keepdims=True)
        e = jnp.exp(logits - m)
        s = jnp.sum(e, axis=0, keepdims=True)
        inv = pl.reciprocal(s, approx=False)   # approx=True is an option; exact keeps 2e-3 margin
        out_ref[b] = (e * inv).astype(out_ref.dtype)


def _stats_stash_kernel(x_ref, w1_ref, b1_ref, y_ref, ysum_ref, ysq_ref):
    """Tiled pass 1: conv1 on a (Cin, Pt) tile, stash y (bf16) and accumulate per-channel
    sum / sum-of-squares into VMEM-resident (mid, 1) outputs across the spatial grid axis."""
    t = pl.program_id(1)
    x = x_ref[...].astype(jnp.float32)                                   # (Cin, Pt)
    y = jnp.dot(w1_ref[...], x, preferred_element_type=jnp.float32) + b1_ref[...]
    y_ref[...] = y.astype(y_ref.dtype)                                   # bf16 stash -> HBM
    psum = jnp.sum(y, axis=1, keepdims=True)                             # (mid, 1)
    psq = jnp.sum(y * y, axis=1, keepdims=True)

    @pl.when(t == 0)
    def _init():
        ysum_ref[...] = psum
        ysq_ref[...] = psq

    @pl.when(t > 0)
    def _acc():
        ysum_ref[...] += psum
        ysq_ref[...] += psq


def _norm_head_kernel(y_ref, ysum_ref, ysq_ref, w2_ref, b2_ref, out_ref, *, inv_p):
    """Tiled pass 2: normalize + LeakyReLU + conv2 + softmax on one (mid, Pt) tile."""
    y = y_ref[...].astype(jnp.float32)
    mean = ysum_ref[...] * inv_p
    var = jnp.maximum(ysq_ref[...] * inv_p - mean * mean, 0.0)
    z = (y - mean) * jax.lax.rsqrt(var + EPS)
    a = jnp.maximum(z, SLOPE * z)
    logits = jnp.dot(w2_ref[...], a, preferred_element_type=jnp.float32) + b2_ref[...]
    m = jnp.max(logits, axis=0, keepdims=True)
    e = jnp.exp(logits - m)
    s = jnp.sum(e, axis=0, keepdims=True)
    out_ref[...] = (e * pl.reciprocal(s, approx=False)).astype(out_ref.dtype)


# ----------------------------------------------------------------------------- helpers

def _vmem_budget_bytes():
    """Generation-aware VMEM budget: ~85% of physical per-core VMEM, leaving headroom for
    compiler-internal scratch.  v7x: ~54 of 64 MiB; v5e/v6e: ~108 of 128 MiB."""
    try:
        cap = int(pltpu.get_tpu_info().vmem_capacity_bytes)
    except Exception:
        cap = 64 * 1024 * 1024                      # conservative fallback
    return min(int(cap * 0.85), cap - (8 << 20))


def _fused_est_bytes(nb, cin, mid, num_cls, p, x_itemsize):
    # Heuristic only (ignores compiler-internal scratch); the tiled path is the fallback.
    return (2 * nb * cin * p * x_itemsize           # double-buffered x blocks
            + 2 * nb * num_cls * p * 4              # double-buffered output blocks
            + nb * (cin + 4 * mid + 2 * num_cls) * p * 4)   # live f32 intermediates


def _pick_p_tile(p, cin, mid, x_itemsize, vmem_budget):
    """Largest multiple of 128 dividing P, capped at 8192, whose pass-1 working set fits."""
    cap = min(p, 8192)
    for pt in range(cap - cap % 128, 0, -128):
        if p % pt != 0:
            continue
        est = (2 * cin * pt * x_itemsize + 2 * mid * pt * 2 + (cin + 3 * mid) * pt * 4)
        if est <= vmem_budget:
            return pt
    raise ValueError("tiled path needs D*H*W to be a multiple of 128")


# ----------------------------------------------------------------------------- paths

def _fused_path(x_flat, params, nb, vmem_budget):
    n, cin, p = x_flat.shape
    w1, b1, w2, b2 = params["w1"], params["b1"], params["w2"], params["b2"]
    mid, num_cls = w1.shape[0], w2.shape[0]
    return pl.pallas_call(
        _fused_kernel,
        out_shape=jax.ShapeDtypeStruct((n, num_cls, p), jnp.float32),
        grid_spec=pltpu.PrefetchScalarGridSpec(
            num_scalar_prefetch=0,
            grid=(n // nb,),
            in_specs=[
                pl.BlockSpec((nb, cin, p), lambda i: (i, 0, 0)),
                pl.BlockSpec((mid, cin), lambda i: (0, 0)),
                pl.BlockSpec((mid, 1), lambda i: (0, 0)),
                pl.BlockSpec((num_cls, mid), lambda i: (0, 0)),
                pl.BlockSpec((num_cls, 1), lambda i: (0, 0)),
            ],
            out_specs=pl.BlockSpec((nb, num_cls, p), lambda i: (i, 0, 0)),
        ),
        compiler_params=pltpu.CompilerParams(
            # TODO(synk): on v7x benchmark pltpu.CORE_PARALLEL / core_map on this axis;
            # plain "parallel" may not actually shard across the two TensorCores.
            dimension_semantics=("parallel",),
            vmem_limit_bytes=vmem_budget,
        ),
    )(x_flat, w1, b1, w2, b2)


def _tiled_path(x_flat, params, p_tile, vmem_budget):
    n, cin, p = x_flat.shape
    w1, b1, w2, b2 = params["w1"], params["b1"], params["w2"], params["b2"]
    mid, num_cls = w1.shape[0], w2.shape[0]
    t_steps = p // p_tile

    # Pass 1: conv1 -> bf16 y stash + per-(n, channel) sum / sum-of-squares.
    y, ysum, ysq = pl.pallas_call(
        _stats_stash_kernel,
        out_shape=(
            jax.ShapeDtypeStruct((n, mid, p), STASH_DTYPE),
            jax.ShapeDtypeStruct((n, mid, 1), jnp.float32),
            jax.ShapeDtypeStruct((n, mid, 1), jnp.float32),
        ),
        grid_spec=pltpu.PrefetchScalarGridSpec(
            num_scalar_prefetch=0,
            grid=(n, t_steps),
            in_specs=[
                # TODO(synk): sweep pipeline_mode=pl.Buffered(3) here on HW; tiles are only
                # ~1-2 MiB so a third buffer is cheap VMEM.
                pl.BlockSpec((None, cin, p_tile), lambda b, t: (b, 0, t)),
                pl.BlockSpec((mid, cin), lambda b, t: (0, 0)),
                pl.BlockSpec((mid, 1), lambda b, t: (0, 0)),
            ],
            out_specs=[
                pl.BlockSpec((None, mid, p_tile), lambda b, t: (b, 0, t)),
                pl.BlockSpec((None, mid, 1), lambda b, t: (b, 0, 0)),   # resident accumulator
                pl.BlockSpec((None, mid, 1), lambda b, t: (b, 0, 0)),
            ],
        ),
        compiler_params=pltpu.CompilerParams(
            dimension_semantics=("parallel", "arbitrary"),   # stats reduce over the tile axis
            vmem_limit_bytes=vmem_budget,
        ),
    )(x_flat, w1, b1)

    # Pass 2: normalize + LeakyReLU + conv2 + softmax (every tile independent).
    return pl.pallas_call(
        functools.partial(_norm_head_kernel, inv_p=1.0 / float(p)),
        out_shape=jax.ShapeDtypeStruct((n, num_cls, p), jnp.float32),
        grid_spec=pltpu.PrefetchScalarGridSpec(
            num_scalar_prefetch=0,
            grid=(n, t_steps),
            in_specs=[
                pl.BlockSpec((None, mid, p_tile), lambda b, t: (b, 0, t)),
                pl.BlockSpec((None, mid, 1), lambda b, t: (b, 0, 0)),
                pl.BlockSpec((None, mid, 1), lambda b, t: (b, 0, 0)),
                pl.BlockSpec((num_cls, mid), lambda b, t: (0, 0)),
                pl.BlockSpec((num_cls, 1), lambda b, t: (0, 0)),
            ],
            out_specs=pl.BlockSpec((None, num_cls, p_tile), lambda b, t: (b, 0, t)),
        ),
        compiler_params=pltpu.CompilerParams(
            dimension_semantics=("parallel", "parallel"),
            vmem_limit_bytes=vmem_budget,
        ),
    )(y, ysum, ysq, w2, b2)


# ----------------------------------------------------------------------------- wrapper

def prm_fusion(x, params, *, batch_block=None, p_tile=None, force_tiled=False):
    """x: (N, Cin, D, H, W), NCDHW like PyTorch.  Feed bf16 activations from the producer to
    halve the dominant HBM read.  Returns float32 (N, num_cls, D, H, W) probabilities."""
    n, cin, d, h, w = x.shape
    p = d * h * w
    mid = params["w1"].shape[0]
    num_cls = params["w2"].shape[0]

    x_flat = x.reshape(n, cin, p)        # contiguous (free) reshape: spatial -> lane axis
    budget = _vmem_budget_bytes()

    nb = 1 if batch_block is None else int(batch_block)
    if n % nb != 0:
        raise ValueError("batch_block must divide N")

    fits = _fused_est_bytes(nb, cin, mid, num_cls, p, x.dtype.itemsize) <= budget
    if force_tiled or not fits:
        if p_tile is None:
            p_tile = _pick_p_tile(p, cin, mid, x.dtype.itemsize, budget)
        if p % p_tile != 0 or p_tile % 128 != 0:
            raise ValueError("p_tile must be a multiple of 128 that divides D*H*W")
        out = _tiled_path(x_flat, params, p_tile, budget)
    else:
        out = _fused_path(x_flat, params, nb, budget)
    return out.reshape(n, num_cls, d, h, w)


# ----------------------------------------------------------------------------- reference

def init_params(key, in_channel=64, num_cls=4, mid=16):
    """Conv3d-default uniform(-1/sqrt(fan_in), +1/sqrt(fan_in)); channels-first weights."""
    ks = jax.random.split(key, 4)

    def u(k, shape, fan_in):
        b = 1.0 / np.sqrt(fan_in)
        return jax.random.uniform(k, shape, jnp.float32, -b, b)

    return {
        "w1": u(ks[0], (mid, in_channel), in_channel),
        "b1": u(ks[1], (mid, 1), in_channel),
        "w2": u(ks[2], (num_cls, mid), mid),
        "b2": u(ks[3], (num_cls, 1), mid),
    }


def reference(x, p):
    """Pure-JAX f32 reference of the PyTorch prm_fusion forward (NCDHW)."""
    hi = jax.lax.Precision.HIGHEST

    def bc(b):
        return b[:, 0][None, :, None, None, None]

    y = jnp.einsum("ncdhw,oc->nodhw", x, p["w1"], precision=hi) + bc(p["b1"])
    mean = y.mean(axis=(2, 3, 4), keepdims=True)
    var = ((y - mean) ** 2).mean(axis=(2, 3, 4), keepdims=True)
    z = (y - mean) / jnp.sqrt(var + EPS)
    a = jnp.where(z >= 0, z, SLOPE * z)
    logits = jnp.einsum("ncdhw,oc->nodhw", a, p["w2"], precision=hi) + bc(p["b2"])
    return jax.nn.softmax(logits, axis=1)


# ----------------------------------------------------------------------------- demo

if __name__ == "__main__":
    key = jax.random.PRNGKey(0)
    kx, kp = jax.random.split(key)

    N, in_channel, num_cls = 2, 64, 4
    D, H, W = 4, 8, 32                    # P = 1024 (lane-dense slabs)

    params = init_params(kp, in_channel, num_cls)

    # Producer-side bf16 activations (halves the dominant HBM read); the cast here stands in
    # for the upstream layer emitting bf16 -- the wrapper itself never round-trips x in HBM.
    x = jax.random.normal(kx, (N, in_channel, D, H, W), jnp.float32).astype(jnp.bfloat16)
    ref = reference(x.astype(jnp.float32), params)

    # (a) single-pass fused path (fits VMEM at this size).
    out = jax.block_until_ready(prm_fusion(x, params))
    np.testing.assert_allclose(np.asarray(out), np.asarray(ref), rtol=2e-3, atol=2e-3)

    # (b) tiled two-pass path (what production 128^3 volumes take), forced here with a small
    # tile so it is exercised.  Slightly looser tolerance: the bf16 y-stash (bandwidth
    # tradeoff requested by the review) adds ~1e-3 of rounding to the probabilities.
    out_t = jax.block_until_ready(prm_fusion(x, params, force_tiled=True, p_tile=256))
    np.testing.assert_allclose(np.asarray(out_t), np.asarray(ref), rtol=5e-3, atol=5e-3)

    # (c) batch-blocked single-pass path: amortizes per-grid-step overhead at tiny sizes
    # while still leaving >= 2 grid steps for the v7x two-TensorCore split.
    N2 = 4
    x2 = jax.random.normal(jax.random.PRNGKey(1), (N2, in_channel, D, H, W),
                           jnp.float32).astype(jnp.bfloat16)
    ref2 = reference(x2.astype(jnp.float32), params)
    out2 = jax.block_until_ready(prm_fusion(x2, params, batch_block=2))
    np.testing.assert_allclose(np.asarray(out2), np.asarray(ref2), rtol=2e-3, atol=2e-3)

    print("KERNEL_OK")
</pallas_src>

<mosaic_0001>
module attributes {stable_mosaic.version = 11 : i64} {
  func.func @_fused_kernel(%arg0: i32, %arg1: memref<1x64x1024xbf16, #tpu.memory_space<vmem>>, %arg2: memref<16x64xf32, #tpu.memory_space<vmem>>, %arg3: memref<16x1xf32, #tpu.memory_space<vmem>>, %arg4: memref<4x16xf32, #tpu.memory_space<vmem>>, %arg5: memref<4x1xf32, #tpu.memory_space<vmem>>, %arg6: memref<1x4x1024xf32, #tpu.memory_space<vmem>>) attributes {dimension_semantics = [#tpu.dimension_semantics<parallel>], iteration_bounds = array<i64: 2>, scalar_prefetch = 0 : i64, scratch_operands = 0 : i64, tpu.core_type = #tpu.core_type<tc>, window_params = [{transform_indices = @transform_0, window_bounds = array<i64: 1, 64, 1024>}, {pipeline_mode = #tpu.pipeline_mode<synchronous>, transform_indices = @transform_1, window_bounds = array<i64: 16, 64>}, {pipeline_mode = #tpu.pipeline_mode<synchronous>, transform_indices = @transform_2, window_bounds = array<i64: 16, 1>}, {pipeline_mode = #tpu.pipeline_mode<synchronous>, transform_indices = @transform_3, window_bounds = array<i64: 4, 16>}, {pipeline_mode = #tpu.pipeline_mode<synchronous>, transform_indices = @transform_4, window_bounds = array<i64: 4, 1>}, {transform_indices = @transform_5, window_bounds = array<i64: 1, 4, 1024>}]} {
    %c0 = arith.constant 0 : index
    %c0_0 = arith.constant 0 : index
    %0 = vector.load %arg2[%c0, %c0_0] : memref<16x64xf32, #tpu.memory_space<vmem>>, vector<16x64xf32>
    %c0_1 = arith.constant 0 : index
    %c0_2 = arith.constant 0 : index
    %1 = vector.load %arg3[%c0_1, %c0_2] : memref<16x1xf32, #tpu.memory_space<vmem>>, vector<16x1xf32>
    %c0_3 = arith.constant 0 : index
    %c0_4 = arith.constant 0 : index
    %2 = vector.load %arg4[%c0_3, %c0_4] : memref<4x16xf32, #tpu.memory_space<vmem>>, vector<4x16xf32>
    %c0_5 = arith.constant 0 : index
    %c0_6 = arith.constant 0 : index
    %3 = vector.load %arg5[%c0_5, %c0_6] : memref<4x1xf32, #tpu.memory_space<vmem>>, vector<4x1xf32>
    %c0_7 = arith.constant 0 : index
    %c0_8 = arith.constant 0 : index
    %c0_9 = arith.constant 0 : index
    %4 = vector.load %arg1[%c0_7, %c0_8, %c0_9] : memref<1x64x1024xbf16, #tpu.memory_space<vmem>>, vector<1x64x1024xbf16>
    %5 = vector.shape_cast %4 : vector<1x64x1024xbf16> to vector<64x1024xbf16>
    %6 = arith.extf %5 : vector<64x1024xbf16> to vector<64x1024xf32>
    %cst = arith.constant dense<0.000000e+00> : vector<16x1024xf32>
    %7 = tpu.matmul %0, %6, %cst {dimension_numbers = #tpu.dot_dimension_numbers<[1], [0], [0], [1], [0, 0, 1, 1], [], []>} : vector<16x64xf32>, vector<64x1024xf32>, vector<16x1024xf32> -> vector<16x1024xf32>
    %8 = vector.broadcast %1 : vector<16x1xf32> to vector<16x1024xf32>
    %9 = arith.addf %7, %8 : vector<16x1024xf32>
    %cst_10 = arith.constant dense<0.000000e+00> : vector<16xf32>
    %10 = vector.multi_reduction <add>, %9, %cst_10 [1] : vector<16x1024xf32> to vector<16xf32>
    %11 = vector.shape_cast %10 : vector<16xf32> to vector<16x1xf32>
    %cst_11 = arith.constant 1.024000e+03 : f32
    %12 = vector.broadcast %cst_11 : f32 to vector<16x1xf32>
    %13 = arith.divf %11, %12 : vector<16x1xf32>
    %14 = arith.mulf %9, %9 : vector<16x1024xf32>
    %cst_12 = arith.constant dense<0.000000e+00> : vector<16xf32>
    %15 = vector.multi_reduction <add>, %14, %cst_12 [1] : vector<16x1024xf32> to vector<16xf32>
    %16 = vector.shape_cast %15 : vector<16xf32> to vector<16x1xf32>
    %cst_13 = arith.constant 1.024000e+03 : f32
    %17 = vector.broadcast %cst_13 : f32 to vector<16x1xf32>
    %18 = arith.divf %16, %17 : vector<16x1xf32>
    %19 = arith.mulf %13, %13 : vector<16x1xf32>
    %20 = arith.subf %18, %19 : vector<16x1xf32>
    %cst_14 = arith.constant 0.000000e+00 : f32
    %21 = vector.broadcast %cst_14 : f32 to vector<16x1xf32>
    %22 = arith.maximumf %20, %21 : vector<16x1xf32>
    %23 = vector.broadcast %13 : vector<16x1xf32> to vector<16x1024xf32>
    %24 = arith.subf %9, %23 : vector<16x1024xf32>
    %cst_15 = arith.constant 9.99999974E-6 : f32
    %25 = vector.broadcast %cst_15 : f32 to vector<16x1xf32>
    %26 = arith.addf %22, %25 : vector<16x1xf32>
    %27 = math.rsqrt %26 : vector<16x1xf32>
    %28 = vector.broadcast %27 : vector<16x1xf32> to vector<16x1024xf32>
    %29 = arith.mulf %24, %28 : vector<16x1024xf32>
    %cst_16 = arith.constant 2.000000e-01 : f32
    %30 = vector.broadcast %cst_16 : f32 to vector<16x1024xf32>
    %31 = arith.mulf %30, %29 : vector<16x1024xf32>
    %32 = arith.maximumf %29, %31 : vector<16x1024xf32>
    %cst_17 = arith.constant dense<0.000000e+00> : vector<4x1024xf32>
    %33 = tpu.matmul %2, %32, %cst_17 {dimension_numbers = #tpu.dot_dimension_numbers<[1], [0], [0], [1], [0, 0, 1, 1], [], []>} : vector<4x16xf32>, vector<16x1024xf32>, vector<4x1024xf32> -> vector<4x1024xf32>
    %34 = vector.broadcast %3 : vector<4x1xf32> to vector<4x1024xf32>
    %35 = arith.addf %33, %34 : vector<4x1024xf32>
    %cst_18 = arith.constant dense<0xFF800000> : vector<1024xf32>
    %36 = vector.multi_reduction <maximumf>, %35, %cst_18 [0] : vector<4x1024xf32> to vector<1024xf32>
    %37 = vector.shape_cast %36 : vector<1024xf32> to vector<1x1024xf32>
    %38 = vector.broadcast %37 : vector<1x1024xf32> to vector<4x1024xf32>
    %39 = arith.subf %35, %38 : vector<4x1024xf32>
    %40 = math.exp %39 : vector<4x1024xf32>
    %cst_19 = arith.constant dense<0.000000e+00> : vector<1024xf32>
    %41 = vector.multi_reduction <add>, %40, %cst_19 [0] : vector<4x1024xf32> to vector<1024xf32>
    %42 = vector.shape_cast %41 : vector<1024xf32> to vector<1x1024xf32>
    %43 = tpu.reciprocal %42 : vector<1x1024xf32> -> vector<1x1024xf32>
    %44 = vector.broadcast %43 : vector<1x1024xf32> to vector<4x1024xf32>
    %45 = arith.mulf %40, %44 : vector<4x1024xf32>
    %c0_20 = arith.constant 0 : index
    %c0_21 = arith.constant 0 : index
    %c0_22 = arith.constant 0 : index
    %46 = vector.load %arg6[%c0_20, %c0_21, %c0_22] : memref<1x4x1024xf32, #tpu.memory_space<vmem>>, vector<1x4x1024xf32>
    %47 = vector.shape_cast %46 : vector<1x4x1024xf32> to vector<4x1024xf32>
    %48 = vector.shape_cast %45 : vector<4x1024xf32> to vector<1x4x1024xf32>
    tpu.vector_store %arg6[%c0_20, %c0_21, %c0_22], %48 {strides = array<i32>} : memref<1x4x1024xf32, #tpu.memory_space<vmem>>, vector<1x4x1024xf32>,
    return
  }
  func.func @transform_0(%arg0: i32) -> (i32, i32, i32) {
    %c0_i32 = arith.constant 0 : i32
    %c0_i32_0 = arith.constant 0 : i32
    %c0_i32_1 = arith.constant 0 : i32
    return %arg0, %c0_i32, %c0_i32_0 : i32, i32, i32
  }
  func.func @transform_1(%arg0: i32) -> (i32, i32) {
    %c0_i32 = arith.constant 0 : i32
    %c0_i32_0 = arith.constant 0 : i32
    %c0_i32_1 = arith.constant 0 : i32
    return %c0_i32, %c0_i32_0 : i32, i32
  }
  func.func @transform_2(%arg0: i32) -> (i32, i32) {
    %c0_i32 = arith.constant 0 : i32
    %c0_i32_0 = arith.constant 0 : i32
    %c0_i32_1 = arith.constant 0 : i32
    return %c0_i32, %c0_i32_0 : i32, i32
  }
  func.func @transform_3(%arg0: i32) -> (i32, i32) {
    %c0_i32 = arith.constant 0 : i32
    %c0_i32_0 = arith.constant 0 : i32
    %c0_i32_1 = arith.constant 0 : i32
    return %c0_i32, %c0_i32_0 : i32, i32
  }
  func.func @transform_4(%arg0: i32) -> (i32, i32) {
    %c0_i32 = arith.constant 0 : i32
    %c0_i32_0 = arith.constant 0 : i32
    %c0_i32_1 = arith.constant 0 : i32
    return %c0_i32, %c0_i32_0 : i32, i32
  }
  func.func @transform_5(%arg0: i32) -> (i32, i32, i32) {
    %c0_i32 = arith.constant 0 : i32
    %c0_i32_0 = arith.constant 0 : i32
    %c0_i32_1 = arith.constant 0 : i32
    return %arg0, %c0_i32, %c0_i32_0 : i32, i32, i32
  }
}

</mosaic_0001>

<bundles_post_ra>
// kernel: tpu_custom_call.1
= control target key start
LH: loop header
LB: loop body
LE: loop exit
PB: predicated region body
PF: predicated region fallthrough
CT: control target
= control target key end

     0   :  { %10 = vsyncpa [#allocation3], 0  ;;  %s2145_s0 = inlined_call_operand.hbm [shape: bf16[2,64,1024], index: 0, kind: input, shape index: {}]   ;;  %s2146_s1 = inlined_call_operand.vmem [shape: f32[16,64], index: 1, kind: input, shape index: {}]   ;;  %s2147_s2 = inlined_call_operand.vmem [shape: f32[16,1], index: 2, kind: input, shape index: {}]   ;;  %s2148_s3 = inlined_call_operand.vmem [shape: f32[4,16], index: 3, kind: input, shape index: {}]   ;;  %s2149_s4 = inlined_call_operand.vmem [shape: f32[4,1], index: 4, kind: input, shape index: {}]   ;;  %s2150_s5 = inlined_call_operand.hbm [shape: f32[2,4,1024], index: 5, kind: output, shape index: {}]  }
   0x1   :  { %12 = vsyncpa [#allocation3 + $0x1], 0 }
   0x2   :  { %13 = vsyncpa [#allocation4], 0 }
   0x3   :  { %15 = vsyncpa [#allocation4 + $0x1], 0  ;;  %s1714_s18 = smov 0   ;;  %s1716_s19 = smov 0  }
   0x4   :  { %s1718_s20 = smov 0   ;;  %s1720_s21 = smov 0  }
   0x5 LB: > { %s1735_s22 = sadd.s32 4294967295, %s1676_s21   ;;  %s1352_s23 = sadd.s32 4294967294, %s1676_s21   ;;  %s1676_s21 = sphi %s1720_s21, %s2163_s21   ;;  %s1672_s20 = sphi %s1718_s20, %s2162_s20   ;;  %s1668_s19 = sphi %s1716_s19, %s2161_s19   ;;  %s1664_s18 = sphi %s1714_s18, %s2160_s18  }
   0x6   : > { %s1739_s24 = sadd.s32 1, %s1676_s21   ;;  %s28_s25 = sadd.s32 1, %s1672_s20 }
   0x7   : > { %s25_s26 = ssub.s32 %s1676_s21, %s1739_s24  ;;  %p35_p0 = scmp.ne.s32.totalorder %s1672_s20, %s1668_s19 }
   0x8   : > { %p26_p1 = scmp.eq.s32.totalorder %s25_s26, 0  ;;  %p36_p2 = scmp.eq.s32.totalorder %s1676_s21, 0 }
   0x9   : > { %p41_p3 = scmp.ne.s32.totalorder %s1668_s19, %s1664_s18  ;;  %p42_p4 = scmp.eq.s32.totalorder %s1735_s22, 0 }
   0xa   : > { %s1751_s27 = scalar_select %p26_p1, %s1672_s20, %s28_s25  }
   0xb   : > { %p1753_p5 = por %p36_p2, %p35_p0  ;;  %p1757_p6 = por %p42_p4, %p41_p3 }
   0xc   : > { %p149_p7 = scmp.eq.s32.totalorder %s1735_s22, 1  ;;  %p155_p8 = scmp.eq.s32.totalorder %s1352_s23, 1 }
   0xd   : > { %p1504_p10 = scmp.lt.s32.totalorder %s1676_s21, 2  ;;  %s187_s7 = sand.u32 1, %s1672_s20  }
   0xe   : > { %p1764_p11 = por %p149_p7, %p35_p0  ;;  %p1768_p12 = por %p155_p8, %p41_p3 }
   0xf   : > { %s1378_s8 = sshll.u32 %s1676_s21, 12  ;;  %s1355_s9 = sshll.u32 %s187_s7, 8 }
  0x10   : > { %s2154_s30 = scalar_select %p1764_p11, 1, 0 }
  0x11   : > { %s2155_s6 = scalar_select %p1768_p12, 1, 0 }
  0x12   : > { %s1777_s12 = scalar_lea.hbm %s2145_s0, %s1378_s8  ;;  %s191_s13 = scalar_lea.vmem [#allocation2], %s1355_s9 }
  0x13   : > { %s198_s14 = sshll.u32 %s191_s13, 4  ;;  %p1781_p13 = pnand %p1504_p10, %p1753_p5  ;;  %s1785_s14 = int_to_ptr.vmem [resolvable:$true] %s198_s14 }
  0x14   : > { %s1787_s16 = scalar_lea.sflag [#allocation3], %s187_s7  ;;  %s1580_s17 = scalar_lea.hbm %s1777_s12, 4096 }
  0x15   : > { %p1581_p0 = scmp.ne.s32.totalorder %s1777_s12, %s1580_s17  ;;  %p1582_p1 = pneg %p1781_p13 }
  0x16   : > { %s1585_s26 = scalar_lea.hbm %s2145_s0, 8192  ;;  %p1586_p4 = scmp.lt.u32.totalorder %s1777_s12, %s2145_s0 }
  0x17   : > { %p1583_p2 = pnand %p1582_p1, %p1581_p0  ;;  %p1587_p5 = scmp.lt.u32.totalorder %s1585_s26, %s1580_s17 }
  0x18   : > { %p1589_p8 = scmp.lt.u32.totalorder %s1580_s17, %s1777_s12 }
  0x19   : > { %p1584_p3 = pneg %p1583_p2  ;;  %p1588_p7 = por %p1587_p5, %p1586_p4 }
  0x1b   : > { %p1590_p10 = por %p1589_p8, %p1588_p7 }
  0x1d   : > { %p1591_p9 = pnand %p1590_p10, %p1584_p3 }
  0x1f   : > { %1594 = shalt.err (!%p1591_p9)
}
  0x20   : > { %s1595_s7 = scalar_lea.vmem %s1785_s14, 4096  ;;  %s1678_s9 = smov [#allocation2]  }
  0x21   : > { %p1596_p0 = scmp.ne.s32.totalorder %s1785_s14, %s1595_s7  ;;  %s1600_s10 = sshll.u32 %s1678_s9, 4  ;;  %s1601_s10 = int_to_ptr.vmem [resolvable:$false] %s1600_s10 }
  0x22   : > { %s1602_s11 = scalar_lea.vmem %s1601_s10, 8192  ;;  %p1603_p11 = scmp.lt.s32.totalorder %s1785_s14, %s1601_s10 }
  0x23   : > { %p1598_p2 = pnand %p1596_p0, %p1582_p1  ;;  %p1604_p4 = scmp.lt.s32.totalorder %s1602_s11, %s1595_s7 }
  0x25   : > { %p1599_p12 = pneg %p1598_p2  ;;  %p1605_p5 = por %p1604_p4, %p1603_p11 }
  0x27   : > { %p1606_p7 = pnand %p1605_p5, %p1599_p12 }
  0x29   : > { %1609 = shalt.err (!%p1606_p7)
}
  0x2a   : > { %s1679_s13 = smov 512   ;;  %s1680_s17 = smov 32  }
  0x2b   : > { %1499 = dma.hbm_to_vmem [thread:$0]  (!%p1781_p13), %s1777_s12, 4096, %s1785_s14, %s1787_s16, %s1679_s13, %s1679_s13, %s1680_s17  }
  0x2c   : > { %p1358_p9 = scmp.ge.s32.totalorder %s1676_s21, 1  ;;  %p206_p1 = scmp.lt.s32.totalorder %s1676_s21, 3 }
  0x2e   : > { %p207_p3 = pnand %p1358_p9, %p206_p1 }
  0x2f   : > { %s1818_s23 = sand.u32 (!%p207_p3), 1, %s1668_s19  }
  0x30   : > { %210 = sbr.rel (%p207_p3) target bundleno = 790 (0x316), region = 40  ;;  %s1359_s25 = sshll.u32 (!%p207_p3), %s1818_s23, 8 }
  0x31   : > { %s213_s26 = scalar_lea.sflag (!%p207_p3), [#allocation3], %s1818_s23  ;;  %s1822_s28 = scalar_lea.vmem (!%p207_p3), [#allocation2], %s1359_s25 }
  0x37   : > { %1655 = dma.done.wait (%p1757_p6), %s213_s26, 4096  }
  0x38   : > { %1657 = vsyncadd (%p1757_p6), %s213_s26, 4294963200  ;;  %v1681_v0 = vmov 0.0   ;;  %v1682_v1 = vmov 0   ;;  %v249_v2 = vld [vmem:[%s1822_s28] sm:$0xff]  ;;  %v250_v4 = vld [vmem:[%s1822_s28 + $0x8] sm:$0xff]  ;;  %vm355_vm0 = vcmask 523264  }
  0x39   : > { %426 = vmatprep.mubr.f32.mxu0 %v1681_v0  ;;  %503 = vmatprep.mubr.f32.mxu1 %v1681_v0  ;;  %v253_v3 = vld [vmem:[%s1822_s28 + $0x20] sm:$0xff]  ;;  %v254_v6 = vld [vmem:[%s1822_s28 + $0x28] sm:$0xff]  ;;  %v251_v32 = vld [vmem:[%s1822_s28 + $0x10] sm:$0xff]  ;;  %vm806_vm1 = vcmask 130048   ;;  %vm1094_vm2 = vcmask 1043456   ;;  %s1360_s25 = sshll.u32 %s1818_s23, 5 }
  0x3a   : > { %1542 = vset.pattern.permute.xlu0 %v1682_v1  ;;  %1543 = vset.pattern.permute.xlu1 %v1682_v1  ;;  %v1460_v5 = vcombine.high %v249_v2, %v253_v3  ;;  %v1461_v7 = vcombine.low %v249_v2, %v253_v3  ;;  %v257_v8 = vld [vmem:[%s1822_s28 + $0x40] sm:$0xff]  ;;  %v1468_v10 = vcombine.high %v250_v4, %v254_v6  ;;  %v258_v13 = vld [vmem:[%s1822_s28 + $0x48] sm:$0xff]  ;;  %v255_v33 = vld [vmem:[%s1822_s28 + $0x30] sm:$0xff]  ;;  %s242_s26 = scalar_lea.vmem [#allocation5], %s1360_s25  ;;  %s1268_s16 = scalar_lea.sflag [#allocation4], %s1818_s23 }
  0x3b   : > { %v261_v9 = vld [vmem:[%s1822_s28 + $0x60] sm:$0xff]  ;;  %v1469_v11 = vcombine.low %v250_v4, %v254_v6  ;;  %v262_v14 = vld [vmem:[%s1822_s28 + $0x68] sm:$0xff]  ;;  %v252_v34 = vld [vmem:[%s1822_s28 + $0x18] sm:$0xff]  ;;  %v1476_v39 = vcombine.high %v251_v32, %v255_v33  ;;  %v1477_v47 = vcombine.low %v251_v32, %v255_v33  ;;  %s1282_s29 = sshll.u32 %s242_s26, 4  ;;  %p2157_p11 = scmp.ne.s32.totalorder %s2154_s30, 0  ;;  %s2103_s29 = int_to_ptr.vmem [resolvable:$true] %s1282_s29 }
  0x3c   : > { %v1462_v12 = vcombine.high %v257_v8, %v261_v9  ;;  %v265_v15 = vld [vmem:[%s1822_s28 + $0x80] sm:$0xff]  ;;  %1381 = vmatprep.subr.bf16.mxu0 %v1460_v5  ;;  %v1470_v16 = vcombine.high %v258_v13, %v262_v14  ;;  %v266_v18 = vld [vmem:[%s1822_s28 + $0x88] sm:$0xff]  ;;  %1397 = vmatprep.subr.bf16.mxu1 %v1468_v10  ;;  %v1463_v20 = vcombine.low %v257_v8, %v261_v9  ;;  %v256_v35 = vld [vmem:[%s1822_s28 + $0x38] sm:$0xff]  ;;  %s1610_s8 = scalar_lea.vmem %s2103_s29, 512 }
  0x3d   : > { %v269_v17 = vld [vmem:[%s1822_s28 + $0xa0] sm:$0xff]  ;;  %v270_v19 = vld [vmem:[%s1822_s28 + $0xa8] sm:$0xff]  ;;  %1383 = vmatpush1.bf16.msra.mxu0 %v1461_v7  ;;  %1399 = vmatpush1.bf16.msra.mxu1 %v1469_v11  ;;  %v1471_v21 = vcombine.low %v258_v13, %v262_v14  ;;  %v1484_v41 = vcombine.high %v252_v34, %v256_v35  ;;  %v259_v42 = vld [vmem:[%s1822_s28 + $0x50] sm:$0xff]  ;;  %v1485_v48 = vcombine.low %v252_v34, %v256_v35  ;;  %p1611_p6 = scmp.ne.s32.totalorder %s2103_s29, %s1610_s8 }
  0x3e   : > { %1385 = vmatprep.subr.bf16.mxu0 %v1462_v12  ;;  %v1464_v22 = vcombine.high %v265_v15, %v269_v17  ;;  %1401 = vmatprep.subr.bf16.mxu1 %v1470_v16  ;;  %v1472_v23 = vcombine.high %v266_v18, %v270_v19  ;;  %v273_v24 = vld [vmem:[%s1822_s28 + $0xc0] sm:$0xff]  ;;  %v274_v26 = vld [vmem:[%s1822_s28 + $0xc8] sm:$0xff]  ;;  %v1465_v28 = vcombine.low %v265_v15, %v269_v17  ;;  %v263_v43 = vld [vmem:[%s1822_s28 + $0x70] sm:$0xff] }
  0x3f   : > { %v277_v25 = vld [vmem:[%s1822_s28 + $0xe0] sm:$0xff]  ;;  %v278_v27 = vld [vmem:[%s1822_s28 + $0xe8] sm:$0xff]  ;;  %v1473_v29 = vcombine.low %v266_v18, %v270_v19  ;;  %v260_v44 = vld [vmem:[%s1822_s28 + $0x58] sm:$0xff]  ;;  %v1478_v49 = vcombine.high %v259_v42, %v263_v43  ;;  %v1479_v55 = vcombine.low %v259_v42, %v263_v43  ;;  %p1612_p12 = pnand %p1611_p6, %p2157_p11 }
  0x40   : > { %v1466_v30 = vcombine.high %v273_v24, %v277_v25  ;;  %v1474_v31 = vcombine.high %v274_v26, %v278_v27  ;;  %v245_v36 = vld [vmem:[%s2147_s2] sm:$0xff]  ;;  %v1467_v37 = vcombine.low %v273_v24, %v277_v25  ;;  %v1475_v38 = vcombine.low %v274_v26, %v278_v27  ;;  %v246_v40 = vld [vmem:[%s2147_s2 + $0x8] sm:$0xff]  ;;  %v264_v45 = vld [vmem:[%s1822_s28 + $0x78] sm:$0xff] }
  0x41   : > { %1387 = vmatpush1.bf16.msra.mxu0 %v1463_v20  ;;  %1403 = vmatpush1.bf16.msra.mxu1 %v1471_v21  ;;  %v243_v46 = vld [vmem:[%s2146_s1] sm:$0xff]  ;;  %v1486_v50 = vcombine.high %v260_v44, %v264_v45  ;;  %v267_v51 = vld [vmem:[%s1822_s28 + $0x90] sm:$0xff]  ;;  %v268_v53 = vld [vmem:[%s1822_s28 + $0x98] sm:$0xff]  ;;  %v1487_v57 = vcombine.low %v260_v44, %v264_v45  ;;  %p1613_p13 = pneg %p1612_p12 }
  0x42   : > { %1389 = vmatprep.subr.bf16.mxu0 %v1464_v22  ;;  %1405 = vmatprep.subr.bf16.mxu1 %v1472_v23  ;;  %v271_v52 = vld [vmem:[%s1822_s28 + $0xb0] sm:$0xff]  ;;  %v272_v54 = vld [vmem:[%s1822_s28 + $0xb8] sm:$0xff]  ;;  %v244_v56 = vld [vmem:[%s2146_s1 + $0x8] sm:$0xff] }
  0x43   : > { %347 = vperm.xlu0 %1542, %v245_v36   ;;  %v1480_v58 = vcombine.high %v267_v51, %v271_v52  ;;  %v1488_v59 = vcombine.high %v268_v53, %v272_v54  ;;  %v275_v60 = vld [vmem:[%s1822_s28 + $0xd0] sm:$0xff]  ;;  %v276_v62 = vld [vmem:[%s1822_s28 + $0xd8] sm:$0xff]  ;;  %v1481_v1 = vcombine.low %v267_v51, %v271_v52  ;;  %v1489_v2 = vcombine.low %v268_v53, %v272_v54 }
  0x44   : > { %v279_v61 = vld [vmem:[%s1822_s28 + $0xf0] sm:$0xff]  ;;  %v280_v63 = vld [vmem:[%s1822_s28 + $0xf8] sm:$0xff]  ;;  %s1379_s28 = sshll.u32 %s1735_s22, 9  ;;  %s1683_s22 = smov [#allocation5]  }
  0x45   : > { %1391 = vmatpush1.bf16.msra.mxu0 %v1465_v28  ;;  %1407 = vmatpush1.bf16.msra.mxu1 %v1473_v29  ;;  %v1482_v3 = vcombine.high %v275_v60, %v279_v61  ;;  %v1490_v4 = vcombine.high %v276_v62, %v280_v63  ;;  %v1483_v5 = vcombine.low %v275_v60, %v279_v61  ;;  %s2101_s15 = scalar_lea.hbm %s2150_s5, %s1379_s28  ;;  %s1614_s7 = sshll.u32 %s1683_s22, 4  ;;  %s1615_s7 = int_to_ptr.vmem [resolvable:$false] %s1614_s7 }
  0x46   : > { %1393 = vmatprep.subr.bf16.mxu0 %v1466_v30  ;;  %1409 = vmatprep.subr.bf16.mxu1 %v1474_v31  ;;  %v1491_v6 = vcombine.low %v276_v62, %v280_v63  ;;  %s1616_s9 = scalar_lea.vmem %s1615_s7, 1024  ;;  %p1617_p8 = scmp.lt.s32.totalorder %s2103_s29, %s1615_s7 }
  0x47   : > { %352 = vperm.xlu0 %1542, %v246_v40   ;;  %p1618_p10 = scmp.lt.s32.totalorder %s1616_s9, %s1610_s8 }
  0x49   : > { %1395 = vmatpush1.bf16.msra.mxu0 %v1467_v37  ;;  %1411 = vmatpush1.bf16.msra.mxu1 %v1475_v38  ;;  %p1619_p0 = por %p1618_p10, %p1617_p8 }
  0x4a   : > { %1413 = vmatprep.subr.bf16.mxu0 %v1476_v39  ;;  %1429 = vmatprep.subr.bf16.mxu1 %v1484_v41 }
  0x4b   : > { %p1620_p2 = pnand %p1619_p0, %p1613_p13 }
  0x4c   : > { %1361 = vmatmul.mubr.msk.f32.vlgmr.msra.gmra.mrb[0].mxu0 %vm355_vm0, %v243_v46  ;;  %1363 = vmatmul.mubr.msk.f32.vlgmr.msra.gmra.mrb[0].mxu1 %vm355_vm0, %v243_v46 }
  0x4d   : > { %1415 = vmatpush1.bf16.msra.mxu0 %v1477_v47  ;;  %1431 = vmatpush1.bf16.msra.mxu1 %v1485_v48 }
  0x4e   : > { %432 = vmatprep.mubr.f32.mxu0 %v1681_v0  ;;  %1417 = vmatprep.subr.bf16.mxu0 %v1478_v49 }
  0x4f   : > { %1433 = vmatprep.subr.bf16.mxu1 %v1486_v50  ;;  %509 = vmatprep.mubr.f32.mxu1 %v1681_v0 }
  0x50   : > { %1362 = vmatmul.mubr.msk.f32.gmra.mrb[2].mxu0 %vm355_vm0, %v244_v56  ;;  %1364 = vmatmul.mubr.msk.f32.gmra.mrb[2].mxu1 %vm355_vm0, %v244_v56 }
  0x51   : > { %1419 = vmatpush1.bf16.msra.mxu0 %v1479_v55  ;;  %1435 = vmatpush1.bf16.msra.mxu1 %v1487_v57 }
  0x52   : > { %1421 = vmatprep.subr.bf16.mxu0 %v1480_v58  ;;  %1437 = vmatprep.subr.bf16.mxu1 %v1488_v59 }
  0x53   : > { %580 = vmatprep.mubr.f32.mxu0 %v1681_v0  ;;  %657 = vmatprep.mubr.f32.mxu1 %v1681_v0 }
  0x55   : > { %1423 = vmatpush1.bf16.msra.mxu0 %v1481_v1  ;;  %1439 = vmatpush1.bf16.msra.mxu1 %v1489_v2 }
  0x56   : > { %1425 = vmatprep.subr.bf16.mxu0 %v1482_v3  ;;  %1441 = vmatprep.subr.bf16.mxu1 %v1490_v4 }
  0x59   : > { %1427 = vmatpush1.bf16.msra.mxu0 %v1483_v5  ;;  %1443 = vmatpush1.bf16.msra.mxu1 %v1491_v6 }
  0x5c   : > { %1365 = vmatmul.mubr.msk.f32.vlgmr.msra.gmra.mrb[4].mxu0 %vm355_vm0, %v243_v46  ;;  %1367 = vmatmul.mubr.msk.f32.vlgmr.msra.gmra.mrb[4].mxu1 %vm355_vm0, %v243_v46 }
  0x5d   : > { %586 = vmatprep.mubr.f32.mxu0 %v1681_v0  ;;  %663 = vmatprep.mubr.f32.mxu1 %v1681_v0 }
  0x60   : > { %1366 = vmatmul.mubr.msk.f32.gmra.mrb[6].mxu0 %vm355_vm0, %v244_v56  ;;  %1368 = vmatmul.mubr.msk.f32.gmra.mrb[6].mxu1 %vm355_vm0, %v244_v56 }
  0x61   : > { %874 = vmatprep.mubr.f32.mxu0 %v1681_v0  ;;  %945 = vmatprep.mubr.f32.mxu1 %v1681_v0 }
  0xc2   : > { %v348_v7 = vpop.permute.xlu0 %347 }
  0xc6   : > { %v1894_v14 = vpop.permute.xlu0 %352 }
 0x11f   : > { %v428_v8 = vpop.f32.mrb[0].mxu0  ;;  %v505_v10 = vpop.f32.mrb[0].mxu1 }
 0x120   : > { %v430_v9 = vpop.f32.mrb[1].mxu0  ;;  %v507_v11 = vpop.f32.mrb[1].mxu1  ;;  %v1890_v12 = vadd.f32 %v428_v8, %v348_v7  ;;  %v1906_v23 = vadd.f32 %v505_v10, %v348_v7 }
 0x121   : > { %v1892_v13 = vadd.f32 %v430_v9, %v348_v7  ;;  %v1919_v30 = vadd.f32 %v507_v11, %v348_v7 }
 0x122   : > { %v691_v21 = vmul.f32 %v1890_v12, %v1890_v12  ;;  %v693_v29 = vmul.f32 %v1906_v23, %v1906_v23 }
 0x123   : > { %v434_v15 = vpop.f32.mrb[2].mxu0  ;;  %v511_v17 = vpop.f32.mrb[2].mxu1  ;;  %v692_v22 = vmul.f32 %v1892_v13, %v1892_v13  ;;  %v670_v24 = vadd.f32 %v1892_v13, %v1890_v12  ;;  %v694_v37 = vmul.f32 %v1919_v30, %v1919_v30 }
 0x124   : > { %v436_v16 = vpop.f32.mrb[3].mxu0  ;;  %v1897_v18 = vadd.f32 %v434_v15, %v1894_v14  ;;  %v513_v20 = vpop.f32.mrb[3].mxu1  ;;  %v1915_v27 = vadd.f32 %v511_v17, %v1894_v14 }
 0x125   : > { %v1900_v19 = vadd.f32 %v436_v16, %v1894_v14  ;;  %v707_v28 = vadd.f32 %v692_v22, %v691_v21  ;;  %v671_v31 = vadd.f32 %v670_v24, %v1906_v23  ;;  %v1927_v35 = vadd.f32 %v513_v20, %v1894_v14 }
 0x126   : > { %v699_v25 = vmul.f32 %v1897_v18, %v1897_v18  ;;  %v701_v34 = vmul.f32 %v1915_v27, %v1915_v27 }
 0x127   : > { %v700_v26 = vmul.f32 %v1900_v19, %v1900_v19  ;;  %v679_v32 = vadd.f32 %v1900_v19, %v1897_v18  ;;  %v708_v36 = vadd.f32 %v707_v28, %v693_v29  ;;  %v672_v39 = vadd.f32 %v671_v31, %v1919_v30 }
 0x128   : > { %v702_v45 = vmul.f32 %v1927_v35, %v1927_v35 }
 0x129   : > { %v716_v33 = vadd.f32 %v700_v26, %v699_v25  ;;  %v680_v40 = vadd.f32 %v679_v32, %v1915_v27  ;;  %v709_v48 = vadd.f32 %v708_v36, %v694_v37 }
 0x12b   : > { %v717_v44 = vadd.f32 %v716_v33, %v701_v34  ;;  %v681_v54 = vadd.f32 %v680_v40, %v1927_v35 }
 0x12d   : > { %v718_v60 = vadd.f32 %v717_v44, %v702_v45 }
 0x12f   : > { %v582_v38 = vpop.f32.mrb[4].mxu0  ;;  %v659_v42 = vpop.f32.mrb[4].mxu1 }
 0x130   : > { %v1933_v41 = vadd.f32 %v582_v38, %v348_v7  ;;  %v584_v43 = vpop.f32.mrb[5].mxu0  ;;  %v661_v47 = vpop.f32.mrb[5].mxu1  ;;  %v1942_v51 = vadd.f32 %v659_v42, %v348_v7 }
 0x131   : > { %v1937_v46 = vadd.f32 %v584_v43, %v348_v7  ;;  %v1951_v61 = vadd.f32 %v661_v47, %v348_v7 }
 0x132   : > { %v673_v49 = vadd.f32 %v672_v39, %v1933_v41  ;;  %v695_v50 = vmul.f32 %v1933_v41, %v1933_v41  ;;  %v697_v5 = vmul.f32 %v1942_v51, %v1942_v51 }
 0x133   : > { %v696_v52 = vmul.f32 %v1937_v46, %v1937_v46  ;;  %v588_v53 = vpop.f32.mrb[6].mxu0  ;;  %v665_v57 = vpop.f32.mrb[6].mxu1  ;;  %v698_v11 = vmul.f32 %v1951_v61, %v1951_v61 }
 0x134   : > { %v710_v55 = vadd.f32 %v709_v48, %v695_v50  ;;  %v1948_v56 = vadd.f32 %v588_v53, %v1894_v14  ;;  %v590_v58 = vpop.f32.mrb[7].mxu0  ;;  %v674_v59 = vadd.f32 %v673_v49, %v1937_v46  ;;  %v667_v63 = vpop.f32.mrb[7].mxu1  ;;  %v1960_v3 = vadd.f32 %v665_v57, %v1894_v14 }
 0x135   : > { %v1954_v62 = vadd.f32 %v590_v58, %v1894_v14  ;;  %v1974_v17 = vadd.f32 %v667_v63, %v1894_v14  ;;  %v248_v14 = vld [vmem:[%s2149_s4] sm:$0xf] }
 0x136   : > { %v682_v1 = vadd.f32 %v681_v54, %v1948_v56  ;;  %v703_v2 = vmul.f32 %v1948_v56, %v1948_v56  ;;  %v675_v4 = vadd.f32 %v674_v59, %v1942_v51  ;;  %v711_v7 = vadd.f32 %v710_v55, %v696_v52 }
 0x137   : > { %v704_v6 = vmul.f32 %v1954_v62, %v1954_v62  ;;  %v705_v16 = vmul.f32 %v1960_v3, %v1960_v3  ;;  %v706_v26 = vmul.f32 %v1974_v17, %v1974_v17 }
 0x138   : > { %v719_v8 = vadd.f32 %v718_v60, %v703_v2  ;;  %v683_v9 = vadd.f32 %v682_v1, %v1954_v62  ;;  %v676_v10 = vadd.f32 %v675_v4, %v1951_v61  ;;  %v712_v15 = vadd.f32 %v711_v7, %v697_v5 }
 0x13a   : > { %677 = vadd.xlane.f32.xlu1 %v676_v10  ;;  %v684_v20 = vadd.f32 %v683_v9, %v1960_v3  ;;  %v720_v21 = vadd.f32 %v719_v8, %v704_v6  ;;  %v713_v22 = vadd.f32 %v712_v15, %v698_v11 }
 0x13c   : > { %v685_v24 = vadd.f32 %v684_v20, %v1974_v17  ;;  %v721_v25 = vadd.f32 %v720_v21, %v705_v16  ;;  %714 = vadd.xlane.f32.xlu0 %v713_v22 }
 0x13e   : > { %686 = vadd.xlane.f32.xlu1 %v685_v24  ;;  %v722_v28 = vadd.f32 %v721_v25, %v706_v26 }
 0x142   : > { %723 = vadd.xlane.f32.xlu1 %v722_v28 }
 0x153   : > { %803 = vperm.xlu1 %1543, %v248_v14  }
 0x1c7   : > { %v678_v29 = vpop.xlane.xlu1 %677 }
 0x1c8   : > { %v689_v31 = vmul.f32 0.0009765625, %v678_v29 }
 0x1c9   : > { %v715_v32 = vpop.xlane.xlu0 %714 }
 0x1ca   : > { %v727_v33 = vmul.f32 %v689_v31, %v689_v31  ;;  %v725_v34 = vmul.f32 0.0009765625, %v715_v32  ;;  %v734_v49 = vsub.f32 %v1892_v13, %v689_v31  ;;  %v736_v50 = vsub.f32 %v1919_v30, %v689_v31 }
 0x1cb   : > { %v687_v36 = vpop.xlane.xlu1 %686  ;;  %v733_v52 = vsub.f32 %v1890_v12, %v689_v31  ;;  %v735_v53 = vsub.f32 %v1906_v23, %v689_v31  ;;  %v738_v54 = vsub.f32 %v1937_v46, %v689_v31  ;;  %v740_v57 = vsub.f32 %v1951_v61, %v689_v31 }
 0x1cc   : > { %v1983_v37 = vmul.f32 0.0009765625, %v687_v36  ;;  %v729_v38 = vsub.f32 %v725_v34, %v727_v33  ;;  %v737_v58 = vsub.f32 %v1933_v41, %v689_v31  ;;  %v739_v59 = vsub.f32 %v1942_v51, %v689_v31 }
 0x1ce   : > { %v731_v39 = vmax.f32 %v729_v38, 0.0  ;;  %v728_v42 = vmul.f32 %v1983_v37, %v1983_v37  ;;  %v742_v55 = vsub.f32 %v1900_v19, %v1983_v37  ;;  %v744_v13 = vsub.f32 %v1927_v35, %v1983_v37 }
 0x1cf   : > { %v724_v40 = vpop.xlane.xlu1 %723  ;;  %v741_v12 = vsub.f32 %v1897_v18, %v1983_v37  ;;  %v743_v23 = vsub.f32 %v1915_v27, %v1983_v37  ;;  %v746_v30 = vsub.f32 %v1954_v62, %v1983_v37  ;;  %v748_v51 = vsub.f32 %v1974_v17, %v1983_v37 }
 0x1d0   : > { %v726_v43 = vmul.f32 0.0009765625, %v724_v40  ;;  %v749_v44 = vadd.f32 1e-05, %v731_v39  ;;  %v745_v35 = vsub.f32 %v1948_v56, %v1983_v37  ;;  %v747_v62 = vsub.f32 %v1960_v3, %v1983_v37 }
 0x1d2   : > { %v730_v45 = vsub.f32 %v726_v43, %v728_v42  ;;  %1544 = vrsqrt.f32 %v749_v44 }
 0x1d4   : > { %v732_v47 = vmax.f32 %v730_v45, 0.0 }
 0x1d6   : > { %v750_v48 = vadd.f32 1e-05, %v732_v47 }
 0x1d8   : > { %1546 = vrsqrt.f32 %v750_v48 }
 0x1dc   : > { %v1545_v60 = vpop.eup %1544 }
 0x1dd   : > { %v754_v19 = vmul.f32 %v1545_v60, %v734_v49  ;;  %v756_v46 = vmul.f32 %v1545_v60, %v736_v50  ;;  %v753_v61 = vmul.f32 %v1545_v60, %v733_v52  ;;  %v755_v63 = vmul.f32 %v1545_v60, %v735_v53 }
 0x1de   : > { %v758_v41 = vmul.f32 %v1545_v60, %v738_v54  ;;  %v760_v1 = vmul.f32 %v1545_v60, %v740_v57  ;;  %v757_v5 = vmul.f32 %v1545_v60, %v737_v58  ;;  %v759_v7 = vmul.f32 %v1545_v60, %v739_v59  ;;  %v247_v57 = vld [vmem:[%s2148_s3] sm:$0xf] }
 0x1df   : > { %v770_v2 = vmul.f32 0.2, %v754_v19  ;;  %v772_v18 = vmul.f32 0.2, %v756_v46  ;;  %v769_v4 = vmul.f32 0.2, %v753_v61 }
 0x1e0   : > { %v771_v27 = vmul.f32 0.2, %v755_v63  ;;  %v774_v6 = vmul.f32 0.2, %v758_v41  ;;  %v776_v15 = vmul.f32 0.2, %v760_v1 }
 0x1e1   : > { %v786_v9 = vmax.f32 %v754_v19, %v770_v2  ;;  %v788_v10 = vmax.f32 %v756_v46, %v772_v18  ;;  %v785_v11 = vmax.f32 %v753_v61, %v769_v4  ;;  %v773_v25 = vmul.f32 0.2, %v757_v5 }
 0x1e2   : > { %v1547_v8 = vpop.eup %1546  ;;  %v787_v56 = vmax.f32 %v755_v63, %v771_v27  ;;  %v790_v29 = vmax.f32 %v758_v41, %v774_v6  ;;  %v792_v38 = vmax.f32 %v760_v1, %v776_v15  ;;  %v775_v54 = vmul.f32 0.2, %v759_v7 }
 0x1e3   : > { %v762_v16 = vmul.f32 %v1547_v8, %v742_v55  ;;  %v764_v17 = vmul.f32 %v1547_v8, %v744_v13  ;;  %v761_v20 = vmul.f32 %v1547_v8, %v741_v12  ;;  %v763_v21 = vmul.f32 %v1547_v8, %v743_v23  ;;  %v804_v23 = vpop.permute.xlu1 %803 }
 0x1e4   : > { %v766_v22 = vmul.f32 %v1547_v8, %v746_v30  ;;  %v768_v24 = vmul.f32 %v1547_v8, %v748_v51  ;;  %v765_v33 = vmul.f32 %v1547_v8, %v745_v35  ;;  %v767_v48 = vmul.f32 %v1547_v8, %v747_v62 }
 0x1e5   : > { %v778_v26 = vmul.f32 0.2, %v762_v16  ;;  %v780_v28 = vmul.f32 0.2, %v764_v17  ;;  %v777_v14 = vmul.f32 0.2, %v761_v20  ;;  %v789_v58 = vmax.f32 %v757_v5, %v773_v25 }
 0x1e6   : > { %v779_v31 = vmul.f32 0.2, %v763_v21  ;;  %v782_v3 = vmul.f32 0.2, %v766_v22  ;;  %v784_v32 = vmul.f32 0.2, %v768_v24  ;;  %v791_v59 = vmax.f32 %v759_v7, %v775_v54 }
 0x1e7   : > { %v794_v34 = vmax.f32 %v762_v16, %v778_v26  ;;  %v796_v36 = vmax.f32 %v764_v17, %v780_v28  ;;  %v793_v37 = vmax.f32 %v761_v20, %v777_v14  ;;  %v781_v43 = vmul.f32 0.2, %v765_v33 }
 0x1e8   : > { %v795_v39 = vmax.f32 %v763_v21, %v779_v31  ;;  %v798_v40 = vmax.f32 %v766_v22, %v782_v3  ;;  %v800_v42 = vmax.f32 %v768_v24, %v784_v32  ;;  %v783_v55 = vmul.f32 0.2, %v767_v48 }
 0x1e9   : > { %v1444_v44 = vpack.c.bf16 %v794_v34, %v786_v9  ;;  %v1448_v45 = vpack.c.bf16 %v796_v36, %v788_v10  ;;  %v1446_v47 = vpack.c.bf16 %v793_v37, %v785_v11  ;;  %v797_v50 = vmax.f32 %v765_v33, %v781_v43 }
 0x1ea   : > { %v1450_v49 = vpack.c.bf16 %v795_v39, %v787_v56  ;;  %v1452_v52 = vpack.c.bf16 %v798_v40, %v790_v29  ;;  %v1456_v53 = vpack.c.bf16 %v800_v42, %v792_v38  ;;  %v799_v60 = vmax.f32 %v767_v48, %v783_v55 }
 0x1eb   : > { %1445 = vmatprep.subr.bf16.mxu0 %v1444_v44  ;;  %1449 = vmatprep.subr.bf16.mxu1 %v1448_v45  ;;  %v1454_v13 = vpack.c.bf16 %v797_v50, %v789_v58 }
 0x1ec   : > { %1447 = vmatpush1.bf16.msra.mxu0 %v1446_v47  ;;  %1451 = vmatpush1.bf16.msra.mxu1 %v1450_v49  ;;  %v1458_v12 = vpack.c.bf16 %v799_v60, %v791_v59 }
 0x1ed   : > { %1453 = vmatprep.subr.bf16.mxu0 %v1452_v52  ;;  %1457 = vmatprep.subr.bf16.mxu1 %v1456_v53 }
 0x1ef   : > { %1369 = vmatmul.mubr.msk.f32.vlgmr.msra.gmra.mrb[8].mxu0 %vm806_vm1, %v247_v57  ;;  %1370 = vmatmul.mubr.msk.f32.vlgmr.msra.gmra.mrb[8].mxu1 %vm806_vm1, %v247_v57 }
 0x1f0   : > { %1455 = vmatpush1.bf16.msra.mxu0 %v1454_v13  ;;  %1016 = vmatprep.mubr.f32.mxu0 %v1681_v0 }
 0x1f1   : > { %1459 = vmatpush1.bf16.msra.mxu1 %v1458_v12  ;;  %1087 = vmatprep.mubr.f32.mxu1 %v1681_v0 }
 0x1f3   : > { %1371 = vmatmul.mubr.msk.f32.vlgmr.msra.gmra.mrb[10].mxu0 %vm806_vm1, %v247_v57 }
 0x1f4   : > { %1372 = vmatmul.mubr.msk.f32.vlgmr.msra.gmra.mrb[10].mxu1 %vm806_vm1, %v247_v57 }
 0x2c2   : > { %v876_v30 = vpop.f32.mrb[8].mxu0  ;;  %v947_v19 = vpop.f32.mrb[8].mxu1 }
 0x2c3   : > { %v2016_v46 = vadd.f32 %v876_v30, %v804_v23  ;;  %v2018_v61 = vadd.f32 %v947_v19, %v804_v23  ;;  %v878_v63 = vpop.f32.mrb[9].mxu0  ;;  %v949_v41 = vpop.f32.mrb[9].mxu1 }
 0x2c4   : > { %v2020_v51 = vadd.f32 %v878_v63, %v804_v23  ;;  %v2022_v1 = vadd.f32 %v949_v41, %v804_v23 }
 0x2c5   : > { %v1095_v35 = vsel %vm1094_vm2, %v2016_v46, -inf  ;;  %v1109_v0 = vsel %vm1094_vm2, %v2018_v61, -inf }
 0x2c6   : > { %v1096_v2 = vrot.slane %v1095_v35, 4  ;;  %v1110_v18 = vrot.slane %v1109_v0, 4  ;;  %v1102_v4 = vsel %vm1094_vm2, %v2020_v51, -inf  ;;  %v1116_v5 = vsel %vm1094_vm2, %v2022_v1, -inf  ;;  %v1018_v27 = vpop.f32.mrb[10].mxu0 }
 0x2c7   : > { %v1103_v6 = vrot.slane %v1102_v4, 4  ;;  %v1117_v62 = vrot.slane %v1116_v5, 4  ;;  %v2032_v7 = vadd.f32 %v1018_v27, %v804_v23  ;;  %v1089_v8 = vpop.f32.mrb[10].mxu1  ;;  %v1020_v9 = vpop.f32.mrb[11].mxu0 }
 0x2c8   : > { %v1097_v10 = vmax.f32 %v1095_v35, %v1096_v2  ;;  %v1111_v11 = vmax.f32 %v1109_v0, %v1110_v18  ;;  %v2034_v15 = vadd.f32 %v1089_v8, %v804_v23  ;;  %v2036_v16 = vadd.f32 %v1020_v9, %v804_v23  ;;  %v1091_v17 = vpop.f32.mrb[11].mxu1 }
 0x2c9   : > { %v1104_v20 = vmax.f32 %v1102_v4, %v1103_v6  ;;  %v1118_v21 = vmax.f32 %v1116_v5, %v1117_v62  ;;  %v1123_v56 = vsel %vm1094_vm2, %v2032_v7, -inf  ;;  %v2040_v22 = vadd.f32 %v1091_v17, %v804_v23 }
 0x2ca   : > { %v1098_v24 = vrot.slane %v1097_v10, 2  ;;  %v1112_v25 = vrot.slane %v1111_v11, 2  ;;  %v1124_v26 = vrot.slane %v1123_v56, 4  ;;  %v1137_v28 = vsel %vm1094_vm2, %v2034_v15, -inf }
 0x2cb   : > { %v1105_v14 = vrot.slane %v1104_v20, 2  ;;  %v1119_v29 = vrot.slane %v1118_v21, 2  ;;  %v1138_v31 = vrot.slane %v1137_v28, 4  ;;  %v1130_v3 = vsel %vm1094_vm2, %v2036_v16, -inf }
 0x2cc   : > { %v1099_v32 = vmax.f32 %v1097_v10, %v1098_v24  ;;  %v1113_v33 = vmax.f32 %v1111_v11, %v1112_v25  ;;  %v1125_v34 = vmax.f32 %v1123_v56, %v1124_v26  ;;  %v1131_v36 = vrot.slane %v1130_v3, 4 }
 0x2cd   : > { %v1106_v37 = vmax.f32 %v1104_v20, %v1105_v14  ;;  %v1120_v38 = vmax.f32 %v1118_v21, %v1119_v29  ;;  %v1139_v39 = vmax.f32 %v1137_v28, %v1138_v31  ;;  %v1144_v40 = vsel %vm1094_vm2, %v2040_v22, -inf }
 0x2ce   : > { %v1100_v42 = vrot.slane %v1099_v32, 1  ;;  %v1114_v43 = vrot.slane %v1113_v33, 1  ;;  %v1126_v44 = vrot.slane %v1125_v34, 2  ;;  %v1132_v45 = vmax.f32 %v1130_v3, %v1131_v36 }
 0x2cf   : > { %v1107_v47 = vrot.slane %v1106_v37, 1  ;;  %v1121_v48 = vrot.slane %v1120_v38, 1  ;;  %v1140_v49 = vrot.slane %v1139_v39, 2  ;;  %v1145_v50 = vrot.slane %v1144_v40, 4 }
 0x2d0   : > { %v1101_v52 = vmax.f32 %v1099_v32, %v1100_v42  ;;  %v1115_v53 = vmax.f32 %v1113_v33, %v1114_v43  ;;  %v1127_v54 = vmax.f32 %v1125_v34, %v1126_v44  ;;  %v1133_v55 = vrot.slane %v1132_v45, 2 }
 0x2d1   : > { %v1108_v57 = vmax.f32 %v1106_v37, %v1107_v47  ;;  %v1122_v58 = vmax.f32 %v1120_v38, %v1121_v48  ;;  %v1141_v59 = vmax.f32 %v1139_v39, %v1140_v49  ;;  %v1146_v60 = vmax.f32 %v1144_v40, %v1145_v50 }
 0x2d2   : > { %v1151_v13 = vsub.f32 %v2016_v46, %v1101_v52  ;;  %v1153_v12 = vsub.f32 %v2018_v61, %v1115_v53  ;;  %v1128_v23 = vrot.slane %v1127_v54, 1  ;;  %v1134_v30 = vmax.f32 %v1132_v45, %v1133_v55 }
 0x2d3   : > { %v1152_v19 = vsub.f32 %v2020_v51, %v1108_v57  ;;  %v1154_v63 = vsub.f32 %v2022_v1, %v1122_v58  ;;  %v1142_v41 = vrot.slane %v1141_v59, 1  ;;  %v1147_v35 = vrot.slane %v1146_v60, 2 }
 0x2d4   : > { %v1159_v0 = vmul.f32 1.442695, %v1151_v13  ;;  %v1163_v2 = vmul.f32 1.442695, %v1153_v12  ;;  %v1129_v18 = vmax.f32 %v1127_v54, %v1128_v23  ;;  %v1135_v4 = vrot.slane %v1134_v30, 1 }
 0x2d5   : > { %v1161_v5 = vmul.f32 1.442695, %v1152_v19  ;;  %v1165_v27 = vmul.f32 1.442695, %v1154_v63  ;;  %v1143_v6 = vmax.f32 %v1141_v59, %v1142_v41  ;;  %v1148_v62 = vmax.f32 %v1146_v60, %v1147_v35 }
 0x2d6   : > { %1548 = vpow2.f32 %v1159_v0  ;;  %v1155_v46 = vsub.f32 %v2032_v7, %v1129_v18  ;;  %v1136_v61 = vmax.f32 %v1134_v30, %v1135_v4 }
 0x2d7   : > { %1550 = vpow2.f32 %v1163_v2  ;;  %v1157_v8 = vsub.f32 %v2034_v15, %v1143_v6  ;;  %v1149_v51 = vrot.slane %v1148_v62, 1 }
 0x2d8   : > { %1552 = vpow2.f32 %v1161_v5  ;;  %v1167_v1 = vmul.f32 1.442695, %v1155_v46  ;;  %v1156_v9 = vsub.f32 %v2036_v16, %v1136_v61 }
 0x2d9   : > { %1554 = vpow2.f32 %v1165_v27  ;;  %v1171_v10 = vmul.f32 1.442695, %v1157_v8  ;;  %v1150_v11 = vmax.f32 %v1148_v62, %v1149_v51 }
 0x2da   : > { %1556 = vpow2.f32 %v1167_v1  ;;  %v1169_v17 = vmul.f32 1.442695, %v1156_v9 }
 0x2db   : > { %1558 = vpow2.f32 %v1171_v10  ;;  %v1158_v20 = vsub.f32 %v2040_v22, %v1150_v11 }
 0x2dc   : > { %1560 = vpow2.f32 %v1169_v17 }
 0x2dd   : > { %v1173_v21 = vmul.f32 1.442695, %v1158_v20 }
 0x2df   : > { %1562 = vpow2.f32 %v1173_v21 }
 0x2e0   : > { %v2056_v7 = vpop.eup %1548 }
 0x2e1   : > { %v2058_v56 = vpop.eup %1550  ;;  %v1175_v15 = vsel %vm1094_vm2, %v2056_v7, 0.0 }
 0x2e2   : > { %v2062_v24 = vpop.eup %1552  ;;  %v1176_v16 = vrot.slane %v1175_v15, 4  ;;  %v1189_v25 = vsel %vm1094_vm2, %v2058_v56, 0.0 }
 0x2e3   : > { %v2066_v26 = vpop.eup %1554  ;;  %v1190_v28 = vrot.slane %v1189_v25, 4  ;;  %v1182_v22 = vsel %vm1094_vm2, %v2062_v24, 0.0 }
 0x2e4   : > { %v2070_v14 = vpop.eup %1556  ;;  %v1177_v29 = vadd.f32 %v1176_v16, %v1175_v15  ;;  %v1183_v31 = vrot.slane %v1182_v22, 4  ;;  %v1196_v3 = vsel %vm1094_vm2, %v2066_v26, 0.0 }
 0x2e5   : > { %v2074_v32 = vpop.eup %1558  ;;  %v1191_v33 = vadd.f32 %v1190_v28, %v1189_v25  ;;  %v1197_v34 = vrot.slane %v1196_v3, 4  ;;  %v1203_v36 = vsel %vm1094_vm2, %v2070_v14, 0.0 }
 0x2e6   : > { %v2078_v37 = vpop.eup %1560  ;;  %v1178_v38 = vrot.slane %v1177_v29, 2  ;;  %v1184_v39 = vadd.f32 %v1183_v31, %v1182_v22  ;;  %v1204_v40 = vrot.slane %v1203_v36, 4  ;;  %v1217_v42 = vsel %vm1094_vm2, %v2074_v32, 0.0 }
 0x2e7   : > { %v1192_v43 = vrot.slane %v1191_v33, 2  ;;  %v1198_v44 = vadd.f32 %v1197_v34, %v1196_v3  ;;  %v1218_v45 = vrot.slane %v1217_v42, 4  ;;  %v1210_v47 = vsel %vm1094_vm2, %v2078_v37, 0.0 }
 0x2e8   : > { %v1179_v48 = vadd.f32 %v1178_v38, %v1177_v29  ;;  %v1185_v49 = vrot.slane %v1184_v39, 2  ;;  %v1205_v50 = vadd.f32 %v1204_v40, %v1203_v36  ;;  %v1211_v52 = vrot.slane %v1210_v47, 4 }
 0x2e9   : > { %v2084_v53 = vpop.eup %1562  ;;  %v1193_v54 = vadd.f32 %v1192_v43, %v1191_v33  ;;  %v1199_v55 = vrot.slane %v1198_v44, 2  ;;  %v1219_v57 = vadd.f32 %v1218_v45, %v1217_v42 }
 0x2ea   : > { %v1180_v58 = vrot.slane %v1179_v48, 1  ;;  %v1186_v59 = vadd.f32 %v1185_v49, %v1184_v39  ;;  %v1206_v60 = vrot.slane %v1205_v50, 2  ;;  %v1212_v13 = vadd.f32 %v1211_v52, %v1210_v47 }
 0x2eb   : > { %v1194_v12 = vrot.slane %v1193_v54, 1  ;;  %v1200_v23 = vadd.f32 %v1199_v55, %v1198_v44  ;;  %v1220_v30 = vrot.slane %v1219_v57, 2  ;;  %v1224_v19 = vsel %vm1094_vm2, %v2084_v53, 0.0 }
 0x2ec   : > { %v1181_v63 = vadd.f32 %v1180_v58, %v1179_v48  ;;  %v1187_v41 = vrot.slane %v1186_v59, 1  ;;  %v1207_v35 = vadd.f32 %v1206_v60, %v1205_v50  ;;  %v1213_v0 = vrot.slane %v1212_v13, 2 }
 0x2ed   : > { %v1195_v2 = vadd.f32 %v1194_v12, %v1193_v54  ;;  %v1201_v18 = vrot.slane %v1200_v23, 1  ;;  %v1221_v4 = vadd.f32 %v1220_v30, %v1219_v57  ;;  %v1225_v5 = vrot.slane %v1224_v19, 4 }
 0x2ee   : > { %v1188_v27 = vadd.f32 %v1187_v41, %v1186_v59  ;;  %1564 = vrcp.f32 %v1181_v63  ;;  %v1208_v6 = vrot.slane %v1207_v35, 1  ;;  %v1214_v62 = vadd.f32 %v1213_v0, %v1212_v13 }
 0x2ef   : > { %v1202_v46 = vadd.f32 %v1201_v18, %v1200_v23  ;;  %1566 = vrcp.f32 %v1195_v2  ;;  %v1222_v61 = vrot.slane %v1221_v4, 1  ;;  %v1226_v8 = vadd.f32 %v1225_v5, %v1224_v19 }
 0x2f0   : > { %1568 = vrcp.f32 %v1188_v27  ;;  %v1209_v51 = vadd.f32 %v1208_v6, %v1207_v35  ;;  %v1215_v1 = vrot.slane %v1214_v62, 1 }
 0x2f1   : > { %1570 = vrcp.f32 %v1202_v46  ;;  %v1223_v9 = vadd.f32 %v1222_v61, %v1221_v4  ;;  %v1227_v10 = vrot.slane %v1226_v8, 2 }
 0x2f2   : > { %1572 = vrcp.f32 %v1209_v51  ;;  %v1216_v11 = vadd.f32 %v1215_v1, %v1214_v62 }
 0x2f3   : > { %v1228_v17 = vadd.f32 %v1227_v10, %v1226_v8 }
 0x2f4   : > { %1574 = vrcp.f32 %v1216_v11 }
 0x2f5   : > { %1576 = vrcp.f32 %v1223_v9  ;;  %v1229_v20 = vrot.slane %v1228_v17, 1 }
 0x2f7   : > { %v1230_v21 = vadd.f32 %v1229_v20, %v1228_v17 }
 0x2f8   : > { %v1565_v15 = vpop.eup %1564 }
 0x2f9   : > { %v1567_v16 = vpop.eup %1566  ;;  %v1239_v25 = vmul.f32 %v1565_v15, %v2056_v7  ;;  %1578 = vrcp.f32 %v1230_v21 }
 0x2fa   : > { %v1569_v28 = vpop.eup %1568  ;;  %v1241_v22 = vmul.f32 %v1567_v16, %v2058_v56 }
 0x2fb   : > { %v1571_v29 = vpop.eup %1570  ;;  %v1240_v31 = vmul.f32 %v1569_v28, %v2062_v24 }
 0x2fc   : > { %v1573_v3 = vpop.eup %1572  ;;  %v1242_v33 = vmul.f32 %v1571_v29, %v2066_v26 }
 0x2fd   : > { %v1255_v34 = vcombine.low %v1239_v25, %v1240_v31  ;;  %v1243_v36 = vmul.f32 %v1573_v3, %v2070_v14 }
 0x2fe   : > { %v1575_v38 = vpop.eup %1574  ;;  %v1256_v39 = vcombine.low %v1241_v22, %v1242_v33 }
 0x2ff   : > { %v1577_v40 = vpop.eup %1576  ;;  %v1244_v7 = vmul.f32 %v1575_v38, %v2078_v37  ;;  %1263 = vst [vmem:[%s242_s26] sm:$0xff] %v1255_v34 }
 0x300   : > { %1264 = vst [vmem:[%s242_s26 + $0x8] sm:$0xff] %v1256_v39  ;;  %v1245_v24 = vmul.f32 %v1577_v40, %v2074_v32 }
 0x301   : > { %v1257_v56 = vcombine.low %v1243_v36, %v1244_v7 }
 0x303   : > { %v1579_v42 = vpop.eup %1578  ;;  %1265 = vst [vmem:[%s242_s26 + $0x10] sm:$0xff] %v1257_v56 }
 0x304   : > { %v1246_v26 = vmul.f32 %v1579_v42, %v2084_v53 }
 0x306   : > { %v1258_v14 = vcombine.low %v1245_v24, %v1246_v26 }
 0x308   : > { %1266 = vst [vmem:[%s242_s26 + $0x18] sm:$0xff] %v1258_v14 }
 0x309   : > { %1623 = shalt.err (!%p1620_p2)
}
 0x30a   : > { %s1624_s23 = scalar_lea.hbm %s2101_s15, 512  ;;  %s1628_s13 = scalar_lea.hbm %s2150_s5, 1024 }
 0x30b   : > { %p1625_p4 = scmp.ne.s32.totalorder %s2101_s15, %s1624_s23  ;;  %p1629_p9 = scmp.lt.u32.totalorder %s2101_s15, %s2150_s5 }
 0x30c   : > { %p1630_p1 = scmp.lt.u32.totalorder %s1628_s13, %s1624_s23  ;;  %p1632_p6 = scmp.lt.u32.totalorder %s1624_s23, %s2101_s15 }
 0x30d   : > { %p1626_p5 = pnand %p1625_p4, %p2157_p11 }
 0x30e   : > { %p1631_p3 = por %p1630_p1, %p1629_p9 }
 0x30f   : > { %p1627_p7 = pneg %p1626_p5 }
 0x310   : > { %p1633_p12 = por %p1632_p6, %p1631_p3 }
 0x312   : > { %p1634_p13 = pnand %p1633_p12, %p1627_p7 }
 0x314   : > { %1637 = shalt.err (!%p1634_p13)
}
 0x315   : > { %1494 = dma.vmem_to_hbm [thread:$0]  (%p2157_p11), %s2103_s29, 512, %s2101_s15, %s1268_s16  }
 0x316 PF: > { %s1294_s26 = sand.u32 1, %s1664_s18   ;;  %p2158_p8 = scmp.ne.s32.totalorder %s2155_s6, 0 }
 0x317   : > { %p2159_p10 = scmp.ge.s32.totalorder %s1676_s21, 2  ;;  %s1295_s28 = scalar_lea.sflag [#allocation4], %s1294_s26 }
 0x319   : > { %p1501_p0 = pnand %p2159_p10, %p2158_p8 }
 0x31b   : > { %1659 = dma.done.wait (!%p1501_p0), %s1295_s28, 512  }
 0x31c   : > { %1661 = vsyncadd (!%p1501_p0), %s1295_s28, 4294966784  ;;  %p18_p2 = scmp.ge.s32.totalorder %s1739_s24, 4   ;;  %s2160_s18 = smov %s1668_s19 }
 0x31d   : > { %s2161_s19 = smov %s1672_s20  ;;  %s2162_s20 = smov %s1751_s27 }
 0x31e   : > { %s2163_s21 = smov %s1739_s24  ;;  %20 = sbr.rel (!%p18_p2) target bundleno = 5 (0x5), region = 85 }
 0x325   :  { %1300 = vsyncpa [#allocation3], 1 }
 0x326   :  { %1302 = vsyncpa [#allocation3 + $0x1], 1 }
 0x327   :  { %1303 = vsyncpa [#allocation4], 1 }
 0x328   :  { %1305 = vsyncpa [#allocation4 + $0x1], 1 }

</bundles_post_ra>
